<compile_context>
chip_gen: v6e
topology: v6e:2x2x1
jax: 0.10.0
libtpu: 0.0.40
codegen_flags: <defaults>
</compile_context>

<pallas_src>
import math
from functools import partial

import jax
import jax.numpy as jnp
from jax import lax
from jax.experimental import pallas as pl
from jax.experimental.pallas import tpu as pltpu

_VMEM_LIMIT_BYTES = 48 * 1024 * 1024   # headroom under v7x's 64 MiB physical VMEM
_COMPUTE_DTYPE = jnp.bfloat16          # MXU input dtype (accumulation stays f32)


def _round_up(x, m):
    return (x + m - 1) // m * m


# ----------------------------------------------------------------------------
# Fused low-rank linear:  out = (x @ W1) @ W2 + bias
#   with W1 = B.T (K x R) and W2 = A.T (R x Nout), i.e. x @ (A @ B).T + bias,
# without ever materializing the dense (Nout x K) weight.
# K, R and Nout stay whole per tile (the factors are small by construction,
# rank = E/4); rows are tiled and stream through the double-buffered pipeline,
# so there is no K-reduction grid axis and the bias cannot be double-counted.
# ----------------------------------------------------------------------------
def _lowrank_linear_kernel(x_ref, w1_ref, w2_ref, b_ref, o_ref):
    x = x_ref[...].astype(_COMPUTE_DTYPE)
    # stage 1: rank-r intermediate, f32 accumulation on the MXU
    u = jnp.dot(x, w1_ref[...], preferred_element_type=jnp.float32)
    # stage 2: expand back to Nout and add the bias once
    o_ref[...] = (
        jnp.dot(u.astype(_COMPUTE_DTYPE), w2_ref[...],
                preferred_element_type=jnp.float32)
        + b_ref[...]
    )


def _lowrank_linear(x, w1, w2, bias_row, *, tm=256):
    """x: (M, K) f32, w1: (K, R) bf16, w2: (R, Nout) bf16, bias_row: (1, Nout) f32."""
    M, K = x.shape
    R = w1.shape[1]
    Nout = w2.shape[1]
    tm = min(tm, _round_up(M, 8))
    m_pad = _round_up(M, tm)
    if m_pad != M:
        x = jnp.pad(x, ((0, m_pad - M), (0, 0)))
    out = pl.pallas_call(
        _lowrank_linear_kernel,
        grid=(m_pad // tm,),
        in_specs=[
            pl.BlockSpec((tm, K), lambda i: (i, 0)),
            pl.BlockSpec((K, R), lambda i: (0, 0)),
            pl.BlockSpec((R, Nout), lambda i: (0, 0)),
            pl.BlockSpec((1, Nout), lambda i: (0, 0)),
        ],
        out_specs=pl.BlockSpec((tm, Nout), lambda i: (i, 0)),
        out_shape=jax.ShapeDtypeStruct((m_pad, Nout), jnp.float32),
        compiler_params=pltpu.CompilerParams(
            dimension_semantics=("parallel",),
            vmem_limit_bytes=_VMEM_LIMIT_BYTES,
        ),
    )(x, w1, w2, bias_row)
    return out[:M] if m_pad != M else out


# ----------------------------------------------------------------------------
# Self-attention over a packed (N, L, 3E) qkv tensor.
# One batch element (all H heads) per grid step; the head-averaged attention
# weights are accumulated inside the kernel and written once.
# ----------------------------------------------------------------------------
def _make_attn_kernel(H, D, E):
    scale = 1.0 / math.sqrt(float(D))

    def kernel(qkv_ref, o_ref, w_ref):
        qkv = qkv_ref[0]  # (L, 3E) f32 — one dense load; heads sliced statically
        outs = []
        w_acc = None
        # TODO(synk): for long sequences with need_weights=False, switch to
        # flash-style S-tiling with an online softmax; with need_weights=True
        # the full (L, S) weight matrix must be materialized anyway.
        for h in range(H):
            q = qkv[:, h * D:(h + 1) * D].astype(_COMPUTE_DTYPE)                 # (L, D)
            k = qkv[:, E + h * D:E + (h + 1) * D].astype(_COMPUTE_DTYPE)         # (S, D)
            v = qkv[:, 2 * E + h * D:2 * E + (h + 1) * D].astype(_COMPUTE_DTYPE) # (S, D)
            # q @ k.T without an explicit transpose (contract the D axes).
            s = lax.dot_general(q, k, (((1,), (1,)), ((), ())),
                                preferred_element_type=jnp.float32) * scale      # (L, S) f32
            s = s - jnp.max(s, axis=-1, keepdims=True)
            p = jnp.exp(s)
            p = p * pl.reciprocal(jnp.sum(p, axis=-1, keepdims=True), approx=True)
            o_h = jnp.dot(p.astype(_COMPUTE_DTYPE), v,
                          preferred_element_type=jnp.float32)                    # (L, D) f32
            outs.append(o_h)
            w_acc = p if w_acc is None else w_acc + p
        # Single lane-dense writes (one (L, E) store, one (L, S) store).
        o_ref[0] = jnp.concatenate(outs, axis=-1)
        w_ref[0] = w_acc * (1.0 / H)

    return kernel


def _self_attention(qkv, num_heads):
    """qkv: (N, L, 3E) f32 -> (attn (N, L, E) f32, weights (N, L, L) f32)."""
    N, L, E3 = qkv.shape
    E = E3 // 3
    D = E // num_heads
    kernel = _make_attn_kernel(num_heads, D, E)
    return pl.pallas_call(
        kernel,
        grid=(N,),
        in_specs=[pl.BlockSpec((1, L, E3), lambda n: (n, 0, 0))],
        out_specs=[
            pl.BlockSpec((1, L, E), lambda n: (n, 0, 0)),
            pl.BlockSpec((1, L, L), lambda n: (n, 0, 0)),
        ],
        out_shape=[
            jax.ShapeDtypeStruct((N, L, E), jnp.float32),
            jax.ShapeDtypeStruct((N, L, L), jnp.float32),
        ],
        compiler_params=pltpu.CompilerParams(
            dimension_semantics=("parallel",),
            vmem_limit_bytes=_VMEM_LIMIT_BYTES,
        ),
    )(qkv)


# ----------------------------------------------------------------------------
# Parameter init (deterministic, mirrors MLA.__init__ / _reset_parameters shapes)
# ----------------------------------------------------------------------------
def _xavier_uniform(key, shape):
    fan_out, fan_in = shape[0], shape[1]
    bound = math.sqrt(6.0 / (fan_in + fan_out))
    return jax.random.uniform(key, shape, jnp.float32, -bound, bound)


def init_mla_params(key, embed_dim, qkv_rank=None, out_rank=None):
    if qkv_rank is None:
        qkv_rank = max(1, embed_dim // 4)
    if out_rank is None:
        out_rank = max(1, embed_dim // 4)
    k0, k1, k2, k3 = jax.random.split(key, 4)
    return {
        "in_proj_A": _xavier_uniform(k0, (3 * embed_dim, qkv_rank)),
        "in_proj_B": _xavier_uniform(k1, (qkv_rank, embed_dim)),
        "in_proj_bias": jnp.zeros((3 * embed_dim,), jnp.float32),
        "out_proj_A": _xavier_uniform(k2, (embed_dim, out_rank)),
        "out_proj_B": _xavier_uniform(k3, (out_rank, embed_dim)),
        "out_proj_bias": jnp.zeros((embed_dim,), jnp.float32),
    }


def _prep_factors(params):
    # Transposed low-rank factors (tiny), cast once to bf16 for the MXU.
    w1_in = params["in_proj_B"].T.astype(_COMPUTE_DTYPE)     # (E, r)
    w2_in = params["in_proj_A"].T.astype(_COMPUTE_DTYPE)     # (r, 3E)
    w1_out = params["out_proj_B"].T.astype(_COMPUTE_DTYPE)   # (E, r_out)
    w2_out = params["out_proj_A"].T.astype(_COMPUTE_DTYPE)   # (r_out, E)
    return w1_in, w2_in, w1_out, w2_out


# ----------------------------------------------------------------------------
# MLA forward (inference: dropout inactive, no masks, add_zero_attn=False)
# ----------------------------------------------------------------------------
@partial(jax.jit, static_argnames=("num_heads",))
def _mla_self_attn_forward(x, params, num_heads):
    L, N, E = x.shape
    H = num_heads
    assert E % H == 0
    w1_in, w2_in, w1_out, w2_out = _prep_factors(params)
    in_b = params["in_proj_bias"].reshape(1, 3 * E).astype(jnp.float32)
    out_b = params["out_proj_bias"].reshape(1, E).astype(jnp.float32)

    # (L, N, E) -> (N*L, E) batch-major so attention reads per-batch blocks.
    xb = jnp.transpose(x, (1, 0, 2)).reshape(N * L, E)
    # Fused QKV projection: one 3E-wide low-rank GEMM, x read from HBM once.
    qkv = _lowrank_linear(xb, w1_in, w2_in, in_b).reshape(N, L, 3 * E)
    attn, weights = _self_attention(qkv, H)                    # (N,L,E), (N,L,L)
    # Output projection through the low-rank factors (never densified).
    out = _lowrank_linear(attn.reshape(N * L, E), w1_out, w2_out, out_b)
    out = jnp.transpose(out.reshape(N, L, E), (1, 0, 2))       # back to (L, N, E)
    return out, weights


def mla_forward(query, key, value, params, num_heads):
    """Matches MLA.forward at inference defaults (batch_first=False, no masks,
    need_weights=True, average_attn_weights=True)."""
    if query is key and key is value:
        return _mla_self_attn_forward(query, params, num_heads=num_heads)

    # TODO(synk): cross-attention (query is not key/value) is not on the scGPT
    # hot path; projections still use the Pallas low-rank GEMM, the attention
    # itself falls back to plain JAX/XLA.
    L, N, E = query.shape
    S = key.shape[0]
    H = num_heads
    D = E // H
    w1_in, w2_in, w1_out, w2_out = _prep_factors(params)
    b = params["in_proj_bias"]
    qb = jnp.transpose(query, (1, 0, 2)).reshape(N * L, E)
    kb = jnp.transpose(key, (1, 0, 2)).reshape(N * S, E)
    vb = jnp.transpose(value, (1, 0, 2)).reshape(N * S, E)
    q = _lowrank_linear(qb, w1_in, w2_in[:, :E], b[:E].reshape(1, E)).reshape(N, L, H, D)
    k = _lowrank_linear(kb, w1_in, w2_in[:, E:2 * E], b[E:2 * E].reshape(1, E)).reshape(N, S, H, D)
    v = _lowrank_linear(vb, w1_in, w2_in[:, 2 * E:], b[2 * E:].reshape(1, E)).reshape(N, S, H, D)
    s = jnp.einsum("nlhd,nshd->nhls", q / math.sqrt(D), k)
    p = jax.nn.softmax(s, axis=-1)
    attn = jnp.einsum("nhls,nshd->nlhd", p, v).reshape(N * L, E)
    out = _lowrank_linear(attn, w1_out, w2_out, params["out_proj_bias"].reshape(1, E))
    out = jnp.transpose(out.reshape(N, L, E), (1, 0, 2))
    return out, p.mean(axis=1)


# ----------------------------------------------------------------------------
# Pure-JAX f32 reference (dense-weight formulation, mirrors the PyTorch module)
# ----------------------------------------------------------------------------
def mla_reference(query, key, value, params, num_heads):
    L, N, E = query.shape
    S = key.shape[0]
    H = num_heads
    D = E // H
    in_proj_w = params["in_proj_A"] @ params["in_proj_B"]        # (3E, E)
    out_proj_w = params["out_proj_A"] @ params["out_proj_B"]     # (E, E)
    b = params["in_proj_bias"]
    q = query @ in_proj_w[:E].T + b[:E]
    k = key @ in_proj_w[E:2 * E].T + b[E:2 * E]
    v = value @ in_proj_w[2 * E:].T + b[2 * E:]
    qh = q.reshape(L, N, H, D).transpose(1, 2, 0, 3)
    kh = k.reshape(S, N, H, D).transpose(1, 2, 0, 3)
    vh = v.reshape(S, N, H, D).transpose(1, 2, 0, 3)
    s = jnp.einsum("nhld,nhsd->nhls", qh / math.sqrt(D), kh)
    p = jax.nn.softmax(s, axis=-1)
    oh = jnp.einsum("nhls,nhsd->nhld", p, vh)
    attn = oh.transpose(2, 0, 1, 3).reshape(L, N, E)
    out = attn @ out_proj_w.T + params["out_proj_bias"]
    return out, p.mean(axis=1)


if __name__ == "__main__":
    embed_dim = 32
    num_heads = 4
    L = 8   # seq len (self-attention: S == L)
    N = 2   # batch

    root = jax.random.PRNGKey(0)
    kp, kx = jax.random.split(root)
    params = init_mla_params(kp, embed_dim)

    x = jax.random.normal(kx, (L, N, embed_dim), jnp.float32)
    query = key = value = x  # self-attention, as used in scGPT transformer blocks

    out, attn_w = mla_forward(query, key, value, params, num_heads)
    out = jax.block_until_ready(out)
    attn_w = jax.block_until_ready(attn_w)

    ref_out, ref_w = mla_reference(query, key, value, params, num_heads)
    assert out.shape == (L, N, embed_dim)
    assert attn_w.shape == (N, L, L)
    # Kernel uses bf16 MXU inputs (f32 accumulation / softmax), so compare
    # against the f32 reference with a matching tolerance.
    assert jnp.allclose(out, ref_out, atol=5e-2, rtol=5e-2), \
        float(jnp.max(jnp.abs(out - ref_out)))
    assert jnp.allclose(attn_w, ref_w, atol=5e-2, rtol=5e-2), \
        float(jnp.max(jnp.abs(attn_w - ref_w)))

    print("KERNEL_OK")
</pallas_src>

<mosaic_0001>
module attributes {stable_mosaic.version = 11 : i64} {
  func.func @_lowrank_linear_kernel(%arg0: i32, %arg1: memref<16x32xf32, #tpu.memory_space<vmem>>, %arg2: memref<32x8xbf16, #tpu.memory_space<vmem>>, %arg3: memref<8x96xbf16, #tpu.memory_space<vmem>>, %arg4: memref<1x96xf32, #tpu.memory_space<vmem>>, %arg5: memref<16x96xf32, #tpu.memory_space<vmem>>) attributes {dimension_semantics = [#tpu.dimension_semantics<parallel>], iteration_bounds = array<i64: 1>, scalar_prefetch = 0 : i64, scratch_operands = 0 : i64, tpu.core_type = #tpu.core_type<tc>, window_params = [{transform_indices = @transform_0, window_bounds = array<i64: 16, 32>}, {pipeline_mode = #tpu.pipeline_mode<synchronous>, transform_indices = @transform_1, window_bounds = array<i64: 32, 8>}, {pipeline_mode = #tpu.pipeline_mode<synchronous>, transform_indices = @transform_2, window_bounds = array<i64: 8, 96>}, {pipeline_mode = #tpu.pipeline_mode<synchronous>, transform_indices = @transform_3, window_bounds = array<i64: 1, 96>}, {transform_indices = @transform_4, window_bounds = array<i64: 16, 96>}]} {
    %c0 = arith.constant 0 : index
    %c0_0 = arith.constant 0 : index
    %0 = vector.load %arg1[%c0, %c0_0] : memref<16x32xf32, #tpu.memory_space<vmem>>, vector<16x32xf32>
    %1 = arith.truncf %0 : vector<16x32xf32> to vector<16x32xbf16>
    %c0_1 = arith.constant 0 : index
    %c0_2 = arith.constant 0 : index
    %2 = vector.load %arg2[%c0_1, %c0_2] : memref<32x8xbf16, #tpu.memory_space<vmem>>, vector<32x8xbf16>
    %cst = arith.constant dense<0.000000e+00> : vector<16x8xf32>
    %3 = tpu.matmul %1, %2, %cst {dimension_numbers = #tpu.dot_dimension_numbers<[1], [0], [0], [1], [0, 0, 1, 1], [], []>} : vector<16x32xbf16>, vector<32x8xbf16>, vector<16x8xf32> -> vector<16x8xf32>
    %4 = arith.truncf %3 : vector<16x8xf32> to vector<16x8xbf16>
    %c0_3 = arith.constant 0 : index
    %c0_4 = arith.constant 0 : index
    %5 = vector.load %arg3[%c0_3, %c0_4] : memref<8x96xbf16, #tpu.memory_space<vmem>>, vector<8x96xbf16>
    %cst_5 = arith.constant dense<0.000000e+00> : vector<16x96xf32>
    %6 = tpu.matmul %4, %5, %cst_5 {dimension_numbers = #tpu.dot_dimension_numbers<[1], [0], [0], [1], [0, 0, 1, 1], [], []>} : vector<16x8xbf16>, vector<8x96xbf16>, vector<16x96xf32> -> vector<16x96xf32>
    %c0_6 = arith.constant 0 : index
    %c0_7 = arith.constant 0 : index
    %7 = vector.load %arg4[%c0_6, %c0_7] : memref<1x96xf32, #tpu.memory_space<vmem>>, vector<1x96xf32>
    %8 = vector.broadcast %7 : vector<1x96xf32> to vector<16x96xf32>
    %9 = arith.addf %6, %8 : vector<16x96xf32>
    %c0_8 = arith.constant 0 : index
    %c0_9 = arith.constant 0 : index
    %10 = vector.load %arg5[%c0_8, %c0_9] : memref<16x96xf32, #tpu.memory_space<vmem>>, vector<16x96xf32>
    tpu.vector_store %arg5[%c0_8, %c0_9], %9 {strides = array<i32>} : memref<16x96xf32, #tpu.memory_space<vmem>>, vector<16x96xf32>,
    return
  }
  func.func @transform_0(%arg0: i32) -> (i32, i32) {
    %c0_i32 = arith.constant 0 : i32
    %c0_i32_0 = arith.constant 0 : i32
    return %arg0, %c0_i32 : i32, i32
  }
  func.func @transform_1(%arg0: i32) -> (i32, i32) {
    %c0_i32 = arith.constant 0 : i32
    %c0_i32_0 = arith.constant 0 : i32
    %c0_i32_1 = arith.constant 0 : i32
    return %c0_i32, %c0_i32_0 : i32, i32
  }
  func.func @transform_2(%arg0: i32) -> (i32, i32) {
    %c0_i32 = arith.constant 0 : i32
    %c0_i32_0 = arith.constant 0 : i32
    %c0_i32_1 = arith.constant 0 : i32
    return %c0_i32, %c0_i32_0 : i32, i32
  }
  func.func @transform_3(%arg0: i32) -> (i32, i32) {
    %c0_i32 = arith.constant 0 : i32
    %c0_i32_0 = arith.constant 0 : i32
    %c0_i32_1 = arith.constant 0 : i32
    return %c0_i32, %c0_i32_0 : i32, i32
  }
  func.func @transform_4(%arg0: i32) -> (i32, i32) {
    %c0_i32 = arith.constant 0 : i32
    %c0_i32_0 = arith.constant 0 : i32
    return %arg0, %c0_i32 : i32, i32
  }
}

module attributes {stable_mosaic.version = 11 : i64} {
  func.func @_lowrank_linear_kernel(%arg0: i32, %arg1: memref<16x32xf32, #tpu.memory_space<vmem>>, %arg2: memref<32x8xbf16, #tpu.memory_space<vmem>>, %arg3: memref<8x32xbf16, #tpu.memory_space<vmem>>, %arg4: memref<1x32xf32, #tpu.memory_space<vmem>>, %arg5: memref<16x32xf32, #tpu.memory_space<vmem>>) attributes {dimension_semantics = [#tpu.dimension_semantics<parallel>], iteration_bounds = array<i64: 1>, scalar_prefetch = 0 : i64, scratch_operands = 0 : i64, tpu.core_type = #tpu.core_type<tc>, window_params = [{transform_indices = @transform_0, window_bounds = array<i64: 16, 32>}, {pipeline_mode = #tpu.pipeline_mode<synchronous>, transform_indices = @transform_1, window_bounds = array<i64: 32, 8>}, {pipeline_mode = #tpu.pipeline_mode<synchronous>, transform_indices = @transform_2, window_bounds = array<i64: 8, 32>}, {pipeline_mode = #tpu.pipeline_mode<synchronous>, transform_indices = @transform_3, window_bounds = array<i64: 1, 32>}, {transform_indices = @transform_4, window_bounds = array<i64: 16, 32>}]} {
    %c0 = arith.constant 0 : index
    %c0_0 = arith.constant 0 : index
    %0 = vector.load %arg1[%c0, %c0_0] : memref<16x32xf32, #tpu.memory_space<vmem>>, vector<16x32xf32>
    %1 = arith.truncf %0 : vector<16x32xf32> to vector<16x32xbf16>
    %c0_1 = arith.constant 0 : index
    %c0_2 = arith.constant 0 : index
    %2 = vector.load %arg2[%c0_1, %c0_2] : memref<32x8xbf16, #tpu.memory_space<vmem>>, vector<32x8xbf16>
    %cst = arith.constant dense<0.000000e+00> : vector<16x8xf32>
    %3 = tpu.matmul %1, %2, %cst {dimension_numbers = #tpu.dot_dimension_numbers<[1], [0], [0], [1], [0, 0, 1, 1], [], []>} : vector<16x32xbf16>, vector<32x8xbf16>, vector<16x8xf32> -> vector<16x8xf32>
    %4 = arith.truncf %3 : vector<16x8xf32> to vector<16x8xbf16>
    %c0_3 = arith.constant 0 : index
    %c0_4 = arith.constant 0 : index
    %5 = vector.load %arg3[%c0_3, %c0_4] : memref<8x32xbf16, #tpu.memory_space<vmem>>, vector<8x32xbf16>
    %cst_5 = arith.constant dense<0.000000e+00> : vector<16x32xf32>
    %6 = tpu.matmul %4, %5, %cst_5 {dimension_numbers = #tpu.dot_dimension_numbers<[1], [0], [0], [1], [0, 0, 1, 1], [], []>} : vector<16x8xbf16>, vector<8x32xbf16>, vector<16x32xf32> -> vector<16x32xf32>
    %c0_6 = arith.constant 0 : index
    %c0_7 = arith.constant 0 : index
    %7 = vector.load %arg4[%c0_6, %c0_7] : memref<1x32xf32, #tpu.memory_space<vmem>>, vector<1x32xf32>
    %8 = vector.broadcast %7 : vector<1x32xf32> to vector<16x32xf32>
    %9 = arith.addf %6, %8 : vector<16x32xf32>
    %c0_8 = arith.constant 0 : index
    %c0_9 = arith.constant 0 : index
    %10 = vector.load %arg5[%c0_8, %c0_9] : memref<16x32xf32, #tpu.memory_space<vmem>>, vector<16x32xf32>
    tpu.vector_store %arg5[%c0_8, %c0_9], %9 {strides = array<i32>} : memref<16x32xf32, #tpu.memory_space<vmem>>, vector<16x32xf32>,
    return
  }
  func.func @transform_0(%arg0: i32) -> (i32, i32) {
    %c0_i32 = arith.constant 0 : i32
    %c0_i32_0 = arith.constant 0 : i32
    return %arg0, %c0_i32 : i32, i32
  }
  func.func @transform_1(%arg0: i32) -> (i32, i32) {
    %c0_i32 = arith.constant 0 : i32
    %c0_i32_0 = arith.constant 0 : i32
    %c0_i32_1 = arith.constant 0 : i32
    return %c0_i32, %c0_i32_0 : i32, i32
  }
  func.func @transform_2(%arg0: i32) -> (i32, i32) {
    %c0_i32 = arith.constant 0 : i32
    %c0_i32_0 = arith.constant 0 : i32
    %c0_i32_1 = arith.constant 0 : i32
    return %c0_i32, %c0_i32_0 : i32, i32
  }
  func.func @transform_3(%arg0: i32) -> (i32, i32) {
    %c0_i32 = arith.constant 0 : i32
    %c0_i32_0 = arith.constant 0 : i32
    %c0_i32_1 = arith.constant 0 : i32
    return %c0_i32, %c0_i32_0 : i32, i32
  }
  func.func @transform_4(%arg0: i32) -> (i32, i32) {
    %c0_i32 = arith.constant 0 : i32
    %c0_i32_0 = arith.constant 0 : i32
    return %arg0, %c0_i32 : i32, i32
  }
}

module attributes {stable_mosaic.version = 11 : i64} {
  func.func @kernel(%arg0: i32, %arg1: memref<1x8x96xf32, #tpu.memory_space<vmem>>, %arg2: memref<1x8x32xf32, #tpu.memory_space<vmem>>, %arg3: memref<1x8x8xf32, #tpu.memory_space<vmem>>) attributes {dimension_semantics = [#tpu.dimension_semantics<parallel>], iteration_bounds = array<i64: 2>, scalar_prefetch = 0 : i64, scratch_operands = 0 : i64, tpu.core_type = #tpu.core_type<tc>, window_params = [{transform_indices = @transform_0, window_bounds = array<i64: 1, 8, 96>}, {transform_indices = @transform_1, window_bounds = array<i64: 1, 8, 32>}, {transform_indices = @transform_2, window_bounds = array<i64: 1, 8, 8>}]} {
    %c0 = arith.constant 0 : index
    %c0_0 = arith.constant 0 : index
    %c0_1 = arith.constant 0 : index
    %0 = vector.load %arg1[%c0, %c0_0, %c0_1] : memref<1x8x96xf32, #tpu.memory_space<vmem>>, vector<1x8x96xf32>
    %1 = vector.shape_cast %0 : vector<1x8x96xf32> to vector<8x96xf32>
    %2 = vector.extract_strided_slice %1 {offsets = [0, 0], sizes = [8, 8], strides = [1, 1]} : vector<8x96xf32> to vector<8x8xf32>
    %3 = arith.truncf %2 : vector<8x8xf32> to vector<8x8xbf16>
    %4 = vector.extract_strided_slice %1 {offsets = [0, 32], sizes = [8, 8], strides = [1, 1]} : vector<8x96xf32> to vector<8x8xf32>
    %5 = arith.truncf %4 : vector<8x8xf32> to vector<8x8xbf16>
    %6 = vector.extract_strided_slice %1 {offsets = [0, 64], sizes = [8, 8], strides = [1, 1]} : vector<8x96xf32> to vector<8x8xf32>
    %7 = arith.truncf %6 : vector<8x8xf32> to vector<8x8xbf16>
    %cst = arith.constant dense<0.000000e+00> : vector<8x8xf32>
    %8 = tpu.matmul %3, %5, %cst {dimension_numbers = #tpu.dot_dimension_numbers<[1], [1], [0], [0], [0, 0, 1, 0], [], []>} : vector<8x8xbf16>, vector<8x8xbf16>, vector<8x8xf32> -> vector<8x8xf32>
    %cst_2 = arith.constant 0.353553385 : f32
    %9 = vector.broadcast %cst_2 : f32 to vector<8x8xf32>
    %10 = arith.mulf %8, %9 : vector<8x8xf32>
    %cst_3 = arith.constant dense<0xFF800000> : vector<8xf32>
    %11 = vector.multi_reduction <maximumf>, %10, %cst_3 [1] : vector<8x8xf32> to vector<8xf32>
    %12 = vector.shape_cast %11 : vector<8xf32> to vector<8x1xf32>
    %13 = vector.broadcast %12 : vector<8x1xf32> to vector<8x8xf32>
    %14 = arith.subf %10, %13 : vector<8x8xf32>
    %15 = math.exp %14 : vector<8x8xf32>
    %cst_4 = arith.constant dense<0.000000e+00> : vector<8xf32>
    %16 = vector.multi_reduction <add>, %15, %cst_4 [1] : vector<8x8xf32> to vector<8xf32>
    %17 = vector.shape_cast %16 : vector<8xf32> to vector<8x1xf32>
    %18 = tpu.reciprocal %17 {approx = true} : vector<8x1xf32> -> vector<8x1xf32>
    %19 = vector.broadcast %18 : vector<8x1xf32> to vector<8x8xf32>
    %20 = arith.mulf %15, %19 : vector<8x8xf32>
    %21 = arith.truncf %20 : vector<8x8xf32> to vector<8x8xbf16>
    %cst_5 = arith.constant dense<0.000000e+00> : vector<8x8xf32>
    %22 = tpu.matmul %21, %7, %cst_5 {dimension_numbers = #tpu.dot_dimension_numbers<[1], [0], [0], [1], [0, 0, 1, 1], [], []>} : vector<8x8xbf16>, vector<8x8xbf16>, vector<8x8xf32> -> vector<8x8xf32>
    %23 = vector.extract_strided_slice %1 {offsets = [0, 8], sizes = [8, 8], strides = [1, 1]} : vector<8x96xf32> to vector<8x8xf32>
    %24 = arith.truncf %23 : vector<8x8xf32> to vector<8x8xbf16>
    %25 = vector.extract_strided_slice %1 {offsets = [0, 40], sizes = [8, 8], strides = [1, 1]} : vector<8x96xf32> to vector<8x8xf32>
    %26 = arith.truncf %25 : vector<8x8xf32> to vector<8x8xbf16>
    %27 = vector.extract_strided_slice %1 {offsets = [0, 72], sizes = [8, 8], strides = [1, 1]} : vector<8x96xf32> to vector<8x8xf32>
    %28 = arith.truncf %27 : vector<8x8xf32> to vector<8x8xbf16>
    %cst_6 = arith.constant dense<0.000000e+00> : vector<8x8xf32>
    %29 = tpu.matmul %24, %26, %cst_6 {dimension_numbers = #tpu.dot_dimension_numbers<[1], [1], [0], [0], [0, 0, 1, 0], [], []>} : vector<8x8xbf16>, vector<8x8xbf16>, vector<8x8xf32> -> vector<8x8xf32>
    %cst_7 = arith.constant 0.353553385 : f32
    %30 = vector.broadcast %cst_7 : f32 to vector<8x8xf32>
    %31 = arith.mulf %29, %30 : vector<8x8xf32>
    %cst_8 = arith.constant dense<0xFF800000> : vector<8xf32>
    %32 = vector.multi_reduction <maximumf>, %31, %cst_8 [1] : vector<8x8xf32> to vector<8xf32>
    %33 = vector.shape_cast %32 : vector<8xf32> to vector<8x1xf32>
    %34 = vector.broadcast %33 : vector<8x1xf32> to vector<8x8xf32>
    %35 = arith.subf %31, %34 : vector<8x8xf32>
    %36 = math.exp %35 : vector<8x8xf32>
    %cst_9 = arith.constant dense<0.000000e+00> : vector<8xf32>
    %37 = vector.multi_reduction <add>, %36, %cst_9 [1] : vector<8x8xf32> to vector<8xf32>
    %38 = vector.shape_cast %37 : vector<8xf32> to vector<8x1xf32>
    %39 = tpu.reciprocal %38 {approx = true} : vector<8x1xf32> -> vector<8x1xf32>
    %40 = vector.broadcast %39 : vector<8x1xf32> to vector<8x8xf32>
    %41 = arith.mulf %36, %40 : vector<8x8xf32>
    %42 = arith.truncf %41 : vector<8x8xf32> to vector<8x8xbf16>
    %cst_10 = arith.constant dense<0.000000e+00> : vector<8x8xf32>
    %43 = tpu.matmul %42, %28, %cst_10 {dimension_numbers = #tpu.dot_dimension_numbers<[1], [0], [0], [1], [0, 0, 1, 1], [], []>} : vector<8x8xbf16>, vector<8x8xbf16>, vector<8x8xf32> -> vector<8x8xf32>
    %44 = arith.addf %20, %41 : vector<8x8xf32>
    %45 = vector.extract_strided_slice %1 {offsets = [0, 16], sizes = [8, 8], strides = [1, 1]} : vector<8x96xf32> to vector<8x8xf32>
    %46 = arith.truncf %45 : vector<8x8xf32> to vector<8x8xbf16>
    %47 = vector.extract_strided_slice %1 {offsets = [0, 48], sizes = [8, 8], strides = [1, 1]} : vector<8x96xf32> to vector<8x8xf32>
    %48 = arith.truncf %47 : vector<8x8xf32> to vector<8x8xbf16>
    %49 = vector.extract_strided_slice %1 {offsets = [0, 80], sizes = [8, 8], strides = [1, 1]} : vector<8x96xf32> to vector<8x8xf32>
    %50 = arith.truncf %49 : vector<8x8xf32> to vector<8x8xbf16>
    %cst_11 = arith.constant dense<0.000000e+00> : vector<8x8xf32>
    %51 = tpu.matmul %46, %48, %cst_11 {dimension_numbers = #tpu.dot_dimension_numbers<[1], [1], [0], [0], [0, 0, 1, 0], [], []>} : vector<8x8xbf16>, vector<8x8xbf16>, vector<8x8xf32> -> vector<8x8xf32>
    %cst_12 = arith.constant 0.353553385 : f32
    %52 = vector.broadcast %cst_12 : f32 to vector<8x8xf32>
    %53 = arith.mulf %51, %52 : vector<8x8xf32>
    %cst_13 = arith.constant dense<0xFF800000> : vector<8xf32>
    %54 = vector.multi_reduction <maximumf>, %53, %cst_13 [1] : vector<8x8xf32> to vector<8xf32>
    %55 = vector.shape_cast %54 : vector<8xf32> to vector<8x1xf32>
    %56 = vector.broadcast %55 : vector<8x1xf32> to vector<8x8xf32>
    %57 = arith.subf %53, %56 : vector<8x8xf32>
    %58 = math.exp %57 : vector<8x8xf32>
    %cst_14 = arith.constant dense<0.000000e+00> : vector<8xf32>
    %59 = vector.multi_reduction <add>, %58, %cst_14 [1] : vector<8x8xf32> to vector<8xf32>
    %60 = vector.shape_cast %59 : vector<8xf32> to vector<8x1xf32>
    %61 = tpu.reciprocal %60 {approx = true} : vector<8x1xf32> -> vector<8x1xf32>
    %62 = vector.broadcast %61 : vector<8x1xf32> to vector<8x8xf32>
    %63 = arith.mulf %58, %62 : vector<8x8xf32>
    %64 = arith.truncf %63 : vector<8x8xf32> to vector<8x8xbf16>
    %cst_15 = arith.constant dense<0.000000e+00> : vector<8x8xf32>
    %65 = tpu.matmul %64, %50, %cst_15 {dimension_numbers = #tpu.dot_dimension_numbers<[1], [0], [0], [1], [0, 0, 1, 1], [], []>} : vector<8x8xbf16>, vector<8x8xbf16>, vector<8x8xf32> -> vector<8x8xf32>
    %66 = arith.addf %44, %63 : vector<8x8xf32>
    %67 = vector.extract_strided_slice %1 {offsets = [0, 24], sizes = [8, 8], strides = [1, 1]} : vector<8x96xf32> to vector<8x8xf32>
    %68 = arith.truncf %67 : vector<8x8xf32> to vector<8x8xbf16>
    %69 = vector.extract_strided_slice %1 {offsets = [0, 56], sizes = [8, 8], strides = [1, 1]} : vector<8x96xf32> to vector<8x8xf32>
    %70 = arith.truncf %69 : vector<8x8xf32> to vector<8x8xbf16>
    %71 = vector.extract_strided_slice %1 {offsets = [0, 88], sizes = [8, 8], strides = [1, 1]} : vector<8x96xf32> to vector<8x8xf32>
    %72 = arith.truncf %71 : vector<8x8xf32> to vector<8x8xbf16>
    %cst_16 = arith.constant dense<0.000000e+00> : vector<8x8xf32>
    %73 = tpu.matmul %68, %70, %cst_16 {dimension_numbers = #tpu.dot_dimension_numbers<[1], [1], [0], [0], [0, 0, 1, 0], [], []>} : vector<8x8xbf16>, vector<8x8xbf16>, vector<8x8xf32> -> vector<8x8xf32>
    %cst_17 = arith.constant 0.353553385 : f32
    %74 = vector.broadcast %cst_17 : f32 to vector<8x8xf32>
    %75 = arith.mulf %73, %74 : vector<8x8xf32>
    %cst_18 = arith.constant dense<0xFF800000> : vector<8xf32>
    %76 = vector.multi_reduction <maximumf>, %75, %cst_18 [1] : vector<8x8xf32> to vector<8xf32>
    %77 = vector.shape_cast %76 : vector<8xf32> to vector<8x1xf32>
    %78 = vector.broadcast %77 : vector<8x1xf32> to vector<8x8xf32>
    %79 = arith.subf %75, %78 : vector<8x8xf32>
    %80 = math.exp %79 : vector<8x8xf32>
    %cst_19 = arith.constant dense<0.000000e+00> : vector<8xf32>
    %81 = vector.multi_reduction <add>, %80, %cst_19 [1] : vector<8x8xf32> to vector<8xf32>
    %82 = vector.shape_cast %81 : vector<8xf32> to vector<8x1xf32>
    %83 = tpu.reciprocal %82 {approx = true} : vector<8x1xf32> -> vector<8x1xf32>
    %84 = vector.broadcast %83 : vector<8x1xf32> to vector<8x8xf32>
    %85 = arith.mulf %80, %84 : vector<8x8xf32>
    %86 = arith.truncf %85 : vector<8x8xf32> to vector<8x8xbf16>
    %cst_20 = arith.constant dense<0.000000e+00> : vector<8x8xf32>
    %87 = tpu.matmul %86, %72, %cst_20 {dimension_numbers = #tpu.dot_dimension_numbers<[1], [0], [0], [1], [0, 0, 1, 1], [], []>} : vector<8x8xbf16>, vector<8x8xbf16>, vector<8x8xf32> -> vector<8x8xf32>
    %88 = arith.addf %66, %85 : vector<8x8xf32>
    %89 = tpu.concatenate %22, %43, %65, %87 in 1 : vector<8x8xf32>, vector<8x8xf32>, vector<8x8xf32>, vector<8x8xf32> -> vector<8x32xf32>
    %c0_21 = arith.constant 0 : index
    %c0_22 = arith.constant 0 : index
    %c0_23 = arith.constant 0 : index
    %90 = vector.load %arg2[%c0_21, %c0_22, %c0_23] : memref<1x8x32xf32, #tpu.memory_space<vmem>>, vector<1x8x32xf32>
    %91 = vector.shape_cast %90 : vector<1x8x32xf32> to vector<8x32xf32>
    %92 = vector.shape_cast %89 : vector<8x32xf32> to vector<1x8x32xf32>
    tpu.vector_store %arg2[%c0_21, %c0_22, %c0_23], %92 {strides = array<i32>} : memref<1x8x32xf32, #tpu.memory_space<vmem>>, vector<1x8x32xf32>,
    %cst_24 = arith.constant 2.500000e-01 : f32
    %93 = vector.broadcast %cst_24 : f32 to vector<8x8xf32>
    %94 = arith.mulf %88, %93 : vector<8x8xf32>
    %c0_25 = arith.constant 0 : index
    %c0_26 = arith.constant 0 : index
    %c0_27 = arith.constant 0 : index
    %95 = vector.load %arg3[%c0_25, %c0_26, %c0_27] : memref<1x8x8xf32, #tpu.memory_space<vmem>>, vector<1x8x8xf32>
    %96 = vector.shape_cast %95 : vector<1x8x8xf32> to vector<8x8xf32>
    %97 = vector.shape_cast %94 : vector<8x8xf32> to vector<1x8x8xf32>
    tpu.vector_store %arg3[%c0_25, %c0_26, %c0_27], %97 {strides = array<i32>} : memref<1x8x8xf32, #tpu.memory_space<vmem>>, vector<1x8x8xf32>,
    return
  }
  func.func @transform_0(%arg0: i32) -> (i32, i32, i32) {
    %c0_i32 = arith.constant 0 : i32
    %c0_i32_0 = arith.constant 0 : i32
    %c0_i32_1 = arith.constant 0 : i32
    return %arg0, %c0_i32, %c0_i32_0 : i32, i32, i32
  }
  func.func @transform_1(%arg0: i32) -> (i32, i32, i32) {
    %c0_i32 = arith.constant 0 : i32
    %c0_i32_0 = arith.constant 0 : i32
    %c0_i32_1 = arith.constant 0 : i32
    return %arg0, %c0_i32, %c0_i32_0 : i32, i32, i32
  }
  func.func @transform_2(%arg0: i32) -> (i32, i32, i32) {
    %c0_i32 = arith.constant 0 : i32
    %c0_i32_0 = arith.constant 0 : i32
    %c0_i32_1 = arith.constant 0 : i32
    return %arg0, %c0_i32, %c0_i32_0 : i32, i32, i32
  }
}

</mosaic_0001>

<bundles_post_ra>
// kernel: _mla_self_attn_forward.5
= control target key start
LH: loop header
LB: loop body
LE: loop exit
PB: predicated region body
PF: predicated region fallthrough
CT: control target
= control target key end

     0   :  { %v174_v0 = vmov 0.0   ;;  %vm175_vm0 = vmmov 0   ;;  %vm37_vm1 = vcmask 261120   ;;  %vm95_vm2 = vcmask 1043456   ;;  %s228_s1 = inlined_call_operand.vmem [shape: bf16[32,8], index: 1, kind: input, shape index: {}]   ;;  %s229_s0 = inlined_call_operand.vmem [shape: f32[16,32], index: 0, kind: input, shape index: {}]   ;;  %s230_s2 = inlined_call_operand.vmem [shape: bf16[8,32], index: 2, kind: input, shape index: {}]   ;;  %s231_s3 = inlined_call_operand.vmem [shape: f32[1,32], index: 3, kind: input, shape index: {}]   ;;  %s232_s4 = inlined_call_operand.vmem [shape: f32[16,32], index: 4, kind: output, shape index: {}]  }
   0x1   :  { %156 = vmatprep.subr.bf16.mxu0 %v174_v0  ;;  %v172_v1 = vld [vmem:[%s228_s1 + $0x8] sm:$0xff]   ;;  %160 = vmatprep.mubr.msk.bf16.mxu0 %vm175_vm0, %v174_v0  ;;  %v173_v2 = vld [vmem:[%s228_s1] sm:$0xff]   ;;  %vm91_vm3 = vcmask 64512  }
   0x2   :  { %164 = vmatprep.subr.bf16.mxu1 %v174_v0  ;;  %166 = vmatprep.mubr.msk.bf16.mxu1 %vm175_vm0, %v174_v0  ;;  %v18_v3 = vld [vmem:[%s229_s0] sm:$0xff]  ;;  %v19_v4 = vld [vmem:[%s229_s0 + $0x8] sm:$0xff] }
   0x3   :  { %157 = vmatpush3.bf16.msra.mxu0 %v172_v1  ;;  %v20_v5 = vpack.c.bf16 %v19_v4, %v18_v3  ;;  %v83_v6 = vld [vmem:[%s230_s2] sm:$0xf] }
   0x4   :  { %158 = vmatprep.subr.bf16.mxu0 %v174_v0  ;;  %v97_v7 = vsel %vm95_vm2, %v83_v6, 0  ;;  %v149_v13 = vld [vmem:[%s231_s3] ss:$0 sm:$0xff] }
   0x5   :  { %165 = vmatpush3.bf16.msra.mxu1 %v97_v7 }
   0x7   :  { %159 = vmatpush3.bf16.msra.mxu0 %v173_v2 }
   0xa   :  { %161 = vmatmul.mubr.msk.bf16.vlgmr.msra.gmra.mxu0 %vm37_vm1, %v20_v5 }
  0xca   :  { %v75_v8 = vpop.f32.mrf.mxu0 }
  0xcc   :  { %v162_v9 = vpop.f32.mrf.mxu0 }
  0xce   :  { %v78_v10 = vpop.f32.mrf.mxu0 }
  0xcf   :  { %v82_v11 = vpack.c.bf16 %v78_v10, %v75_v8 }
  0xd0   :  { %v163_v12 = vpop.f32.mrf.mxu0 }
  0xd1   :  { %167 = vmatmul.mubr.msk.bf16.vlgmr.msra.gmra.mxu1 %vm91_vm3, %v82_v11 }
 0x191   :  { %v133_v14 = vpop.f32.mrf.mxu1 }
 0x192   :  { %v134_v15 = vadd.f32 %v149_v13, %v133_v14 }
 0x193   :  { %v168_v16 = vpop.f32.mrf.mxu1 }
 0x194   :  { %140 = vst.msk [vmem:[%s232_s4] sm:$0xff] %vm37_vm1, %v134_v15 }
 0x195   :  { %v136_v17 = vpop.f32.mrf.mxu1 }
 0x196   :  { %v137_v18 = vadd.f32 %v149_v13, %v136_v17 }
 0x197   :  { %v169_v19 = vpop.f32.mrf.mxu1 }
 0x198   :  { %141 = vst.msk [vmem:[%s232_s4 + $0x8] sm:$0xff] %vm37_vm1, %v137_v18 }

// kernel: _mla_self_attn_forward.3
= control target key start
LH: loop header
LB: loop body
LE: loop exit
PB: predicated region body
PF: predicated region fallthrough
CT: control target
= control target key end

     0   :  { %v175_v0 = vmov 0.0   ;;  %vm176_vm0 = vmmov 0   ;;  %vm37_vm1 = vcmask 261120   ;;  %vm95_vm2 = vcmask 1043456   ;;  %s226_s1 = inlined_call_operand.vmem [shape: bf16[32,8], index: 1, kind: input, shape index: {}]   ;;  %s227_s0 = inlined_call_operand.vmem [shape: f32[16,32], index: 0, kind: input, shape index: {}]   ;;  %s228_s2 = inlined_call_operand.vmem [shape: bf16[8,96], index: 2, kind: input, shape index: {}]   ;;  %s229_s3 = inlined_call_operand.vmem [shape: f32[1,96], index: 3, kind: input, shape index: {}]   ;;  %s230_s4 = inlined_call_operand.vmem [shape: f32[16,96], index: 4, kind: output, shape index: {}]  }
   0x1   :  { %157 = vmatprep.subr.bf16.mxu0 %v175_v0  ;;  %v173_v1 = vld [vmem:[%s226_s1 + $0x8] sm:$0xff]   ;;  %161 = vmatprep.mubr.msk.bf16.mxu0 %vm176_vm0, %v175_v0  ;;  %v174_v2 = vld [vmem:[%s226_s1] sm:$0xff]   ;;  %vm91_vm3 = vcmask 64512   ;;  %vm140_vm4 = vcmask 785408  }
   0x2   :  { %165 = vmatprep.subr.bf16.mxu1 %v175_v0  ;;  %167 = vmatprep.mubr.msk.bf16.mxu1 %vm176_vm0, %v175_v0  ;;  %v18_v3 = vld [vmem:[%s227_s0] sm:$0xff]  ;;  %v19_v4 = vld [vmem:[%s227_s0 + $0x8] sm:$0xff] }
   0x3   :  { %158 = vmatpush3.bf16.msra.mxu0 %v173_v1  ;;  %v20_v5 = vpack.c.bf16 %v19_v4, %v18_v3  ;;  %v83_v6 = vld [vmem:[%s228_s2] sm:$0xf] }
   0x4   :  { %159 = vmatprep.subr.bf16.mxu0 %v175_v0  ;;  %v97_v7 = vsel %vm95_vm2, %v83_v6, 0  ;;  %v150_v13 = vld [vmem:[%s229_s3] ss:$0 sm:$0xff] }
   0x5   :  { %166 = vmatpush3.bf16.msra.mxu1 %v97_v7 }
   0x7   :  { %160 = vmatpush3.bf16.msra.mxu0 %v174_v2 }
   0xa   :  { %162 = vmatmul.mubr.msk.bf16.vlgmr.msra.gmra.mxu0 %vm37_vm1, %v20_v5 }
  0xca   :  { %v75_v8 = vpop.f32.mrf.mxu0 }
  0xcc   :  { %v163_v9 = vpop.f32.mrf.mxu0 }
  0xce   :  { %v78_v10 = vpop.f32.mrf.mxu0 }
  0xcf   :  { %v82_v11 = vpack.c.bf16 %v78_v10, %v75_v8 }
  0xd0   :  { %v164_v12 = vpop.f32.mrf.mxu0 }
  0xd1   :  { %168 = vmatmul.mubr.msk.bf16.vlgmr.msra.gmra.mxu1 %vm91_vm3, %v82_v11 }
 0x191   :  { %v133_v14 = vpop.f32.mrf.mxu1 }
 0x192   :  { %v134_v15 = vadd.f32 %v150_v13, %v133_v14 }
 0x193   :  { %v169_v16 = vpop.f32.mrf.mxu1 }
 0x194   :  { %141 = vst.msk [vmem:[%s230_s4] sm:$0xff] %vm140_vm4, %v134_v15 }
 0x195   :  { %v136_v17 = vpop.f32.mrf.mxu1 }
 0x196   :  { %v137_v18 = vadd.f32 %v150_v13, %v136_v17 }
 0x197   :  { %v170_v19 = vpop.f32.mrf.mxu1 }
 0x198   :  { %142 = vst.msk [vmem:[%s230_s4 + $0x8] sm:$0xff] %vm140_vm4, %v137_v18 }

// kernel: _mla_self_attn_forward.4
= control target key start
LH: loop header
LB: loop body
LE: loop exit
PB: predicated region body
PF: predicated region fallthrough
CT: control target
= control target key end

     0   :  { %8 = vsyncpa [#allocation3], 0  ;;  %s1143_s0 = inlined_call_operand.vmem [shape: f32[2,8,96], index: 0, kind: input, shape index: {}]   ;;  %s1144_s1 = inlined_call_operand.vmem [shape: f32[2,8,32], index: 1, kind: output, shape index: {0}]   ;;  %s1145_s2 = inlined_call_operand.hbm [shape: f32[2,8,8], index: 2, kind: output, shape index: {1}]  }
   0x1   :  { %10 = vsyncpa [#allocation3 + $0x1], 0  ;;  %s974_s9 = smov 0   ;;  %s976_s10 = smov 0  }
   0x2   :  { %s978_s11 = smov 0   ;;  %s980_s12 = smov 0  }
   0x3 LB: > { %s995_s13 = sadd.s32 4294967295, %s940_s12   ;;  %s726_s14 = sadd.s32 4294967294, %s940_s12   ;;  %s940_s12 = sphi %s980_s12, %s1151_s12   ;;  %s936_s11 = sphi %s978_s11, %s1150_s11   ;;  %s932_s10 = sphi %s976_s10, %s1149_s10   ;;  %s928_s9 = sphi %s974_s9, %s1148_s9  }
   0x4   : > { %s999_s15 = sadd.s32 1, %s940_s12   ;;  %s75_s16 = sadd.s32 1, %s936_s11 }
   0x5   : > { %s72_s17 = ssub.s32 %s940_s12, %s999_s15  ;;  %p85_p0 = scmp.ne.s32.totalorder %s936_s11, %s932_s10 }
   0x6   : > { %p73_p1 = scmp.eq.s32.totalorder %s72_s17, 0  ;;  %p86_p2 = scmp.eq.s32.totalorder %s995_s13, 1 }
   0x7   : > { %p91_p3 = scmp.ne.s32.totalorder %s932_s10, %s928_s9  ;;  %p92_p4 = scmp.eq.s32.totalorder %s726_s14, 1 }
   0x8   : > { %s1010_s18 = scalar_select %p73_p1, %s936_s11, %s75_s16  }
   0x9   : > { %p1012_p5 = por %p86_p2, %p85_p0  ;;  %p1016_p6 = por %p92_p4, %p91_p3 }
   0xa   : > { %p729_p7 = scmp.ge.s32.totalorder %s940_s12, 1  ;;  %p117_p8 = scmp.lt.s32.totalorder %s940_s12, 3 }
   0xc   : > { %p118_p9 = pnand %p729_p7, %p117_p8 }
   0xd   : > { %p142_p10 = scmp.lt.s32.totalorder (!%p118_p9), %s995_s13, 1  ;;  %s944_s26 = smov (!%p118_p9), 96  }
   0xe   : > { %121 = sbr.rel (%p118_p9) target bundleno = 1546 (0x60a), region = 24  ;;  %s945_s27 = smov (!%p118_p9), 64  }
   0xf   : > { %s946_s28 = smov (!%p118_p9), 88   ;;  %s947_s29 = smov (!%p118_p9), 72  }
  0x10   : > { %s948_s30 = smov (!%p118_p9), 120   ;;  %s949_s3 = smov (!%p118_p9), 80  }
  0x11   : > { %s950_s4 = smov (!%p118_p9), 112   ;;  %s951_s5 = smov (!%p118_p9), 104  }
  0x12   : > { %s952_s6 = smov (!%p118_p9), 56   ;;  %s953_s7 = smov (!%p118_p9), 48  }
  0x13   : > { %v942_v0 = vmov 0.0   ;;  %vm943_vm0 = vmmov 0   ;;  %s1027_s21 = scalar_select %p142_p10, %s995_s13, 1  ;;  %vm156_vm1 = vcmask 64512   ;;  %vm221_vm2 = vcmask 1043456  }
  0x14   : > { %761 = vmatprep.subr.bf16.mxu0 %v942_v0  ;;  %763 = vmatprep.mubr.msk.bf16.mxu0 %vm943_vm0, %v942_v0  ;;  %s954_s8 = smov 40   ;;  %s139_s14 = sand.u32 1, %s932_s10  }
  0x15   : > { %767 = vmatprep.subr.bf16.mxu1 %v942_v0  ;;  %769 = vmatprep.mubr.msk.bf16.mxu1 %vm943_vm0, %v942_v0  ;;  %s731_s22 = sshll.u32 %s1027_s21, 3  ;;  %s730_s16 = sshll.u32 %s139_s14, 3 }
  0x16   : > { %s145_s25 = scalar_lea.vmem %s1143_s0, %s731_s22  ;;  %s141_s17 = scalar_lea.vmem [#allocation2], %s730_s16 }
  0x17   : > { %v151_v1 = vld [vmem:[%s145_s25] sm:$0xff]  ;;  %s955_s23 = smov 8   ;;  %s742_s24 = sshll.u32 %s995_s13, 7 }
  0x18   : > { %v1038_v2 = vpack.c.bf16 %v151_v1, %v151_v1  ;;  %s643_s25 = sshll.u32 %s141_s17, 4  ;;  %s644_s25 = int_to_ptr.vmem [resolvable:$true] %s643_s25 }
  0x1a   : > { %154 = vrot.lane.b32.xlu0 %v1038_v2, %s944_s26  ;;  %216 = vrot.lane.b32.xlu1 %v1038_v2, %s945_s27 }
  0x1e   : > { %267 = vrot.lane.b32.xlu1 %v1038_v2, %s946_s28  ;;  %s641_s28 = scalar_lea.hbm %s1145_s2, %s742_s24 }
  0x8c   : > { %v155_v3 = vpop.permute.xlu0 %154  ;;  %v217_v11 = vpop.permute.xlu1 %216 }
  0x8d   : > { %v161_v4 = vsel %vm156_vm1, %v155_v3, 0  ;;  %v223_v12 = vsel %vm221_vm2, %v217_v11, 0 }
  0x8e   : > { %762 = vmatpush3.bf16.xpose.msra.mxu0 %v161_v4  ;;  %768 = vmatpush3.bf16.msra.mxu1 %v223_v12 }
  0x8f   : > { %779 = vmatprep.subr.bf16.mxu0 %v942_v0  ;;  %773 = vmatprep.subr.bf16.mxu1 %v942_v0 }
  0x90   : > { %v268_v18 = vpop.permute.xlu1 %267 }
  0x91   : > { %v273_v24 = vsel %vm156_vm1, %v268_v18, 0 }
  0x95   : > { %764 = vmatmul.mubr.msk.bf16.vlgmr.msra.gmra.mxu0 %vm156_vm1, %v1038_v2 }
  0x96   : > { %781 = vmatprep.mubr.msk.bf16.mxu0 %vm943_vm0, %v942_v0 }
 0x155   : > { %v197_v5 = vpop.f32.mrf.mxu0 }
 0x156   : > { %v203_v6 = vmul.f32 0.35355338, %v197_v5 }
 0x157   : > { %v765_v7 = vpop.f32.mrf.mxu0 }
 0x158   : > { %v204_v8 = vsel %vm156_vm1, %v203_v6, -inf }
 0x159   : > { %205 = vmax.xlane.f32.xlu0 %v204_v8  ;;  %v200_v9 = vpop.f32.mrf.mxu0 }
 0x15b   : > { %v766_v10 = vpop.f32.mrf.mxu0 }
 0x16f   : > { %491 = vrot.lane.b32.xlu0 %v1038_v2, %s947_s29  ;;  %s627_s29 = scalar_lea.sflag [#allocation3], %s139_s14 }
 0x1e2   : > { %v206_v13 = vpop.xlane.xlu0 %205 }
 0x1e3   : > { %v207_v14 = vsub.f32 %v203_v6, %v206_v13 }
 0x1e5   : > { %v208_v15 = vmul.f32 1.442695, %v207_v14 }
 0x1e6   : > { %v492_v27 = vpop.permute.xlu0 %491 }
 0x1e7   : > { %864 = vpow2.f32 %v208_v15  ;;  %v497_v29 = vsel %vm156_vm1, %v492_v27, 0 }
 0x1f4   : > { %v865_v16 = vpop.eup %864 }
 0x1f5   : > { %v210_v17 = vsel %vm156_vm1, %v865_v16, 0.0 }
 0x1f6   : > { %211 = vadd.xlane.f32.xlu1 %v210_v17 }
 0x207   : > { %265 = vrot.lane.b32.xlu1 %v1038_v2, %s948_s30  ;;  %s880_s30 = scalar_lea.vmem %s644_s25, 128 }
 0x208   : > { %p881_p11 = scmp.ne.s32.totalorder %s644_s25, %s880_s30 }
 0x20a   : > { %p882_p12 = pnand %p881_p11, %p1012_p5 }
 0x20b   : > { %379 = vrot.lane.b32.xlu1 %v1038_v2, %s949_s3  ;;  %s956_s3 = smov [#allocation2]  }
 0x20c   : > { %p883_p13 = pneg %p882_p12 }
 0x20f   : > { %377 = vrot.lane.b32.xlu1 %v1038_v2, %s950_s4  ;;  %s884_s4 = sshll.u32 %s956_s3, 4  ;;  %s885_s4 = int_to_ptr.vmem [resolvable:$false] %s884_s4 }
 0x210   : > { %p887_p0 = scmp.lt.s32.totalorder %s644_s25, %s885_s4 }
 0x213   : > { %489 = vrot.lane.b32.xlu1 %v1038_v2, %s951_s5  ;;  %s886_s5 = scalar_lea.vmem %s885_s4, 256 }
 0x214   : > { %p888_p1 = scmp.lt.s32.totalorder %s886_s5, %s880_s30 }
 0x216   : > { %p889_p2 = por %p888_p1, %p887_p0 }
 0x218   : > { %p890_p3 = pnand %p889_p2, %p883_p13 }
 0x27f   : > { %v212_v19 = vpop.xlane.xlu1 %211 }
 0x280   : > { %866 = vrcp.f32 %v212_v19 }
 0x283   : > { %v266_v22 = vpop.permute.xlu1 %265 }
 0x287   : > { %v380_v25 = vpop.permute.xlu1 %379 }
 0x288   : > { %v385_v26 = vsel %vm156_vm1, %v380_v25, 0 }
 0x28b   : > { %v378_v28 = vpop.permute.xlu1 %377 }
 0x28d   : > { %v867_v20 = vpop.eup %866 }
 0x28e   : > { %v1058_v21 = vmul.f32 %v867_v20, %v865_v16 }
 0x28f   : > { %v490_v30 = vpop.permute.xlu1 %489 }
 0x290   : > { %v215_v23 = vpack.c.bf16 %v1058_v21, %v1058_v21 }
 0x292   : > { %770 = vmatmul.mubr.msk.bf16.vlgmr.msra.gmra.mxu1 %vm156_vm1, %v215_v23 }
 0x293   : > { %774 = vmatpush3.bf16.xpose.msra.mxu1 %v273_v24  ;;  %775 = vmatprep.mubr.msk.bf16.mxu1 %vm943_vm0, %v942_v0 }
 0x294   : > { %785 = vmatprep.subr.bf16.mxu1 %v942_v0 }
 0x29a   : > { %776 = vmatmul.mubr.msk.bf16.vlgmr.msra.gmra.mxu1 %vm156_vm1, %v266_v22 }
 0x29b   : > { %786 = vmatpush3.bf16.xpose.msra.mxu1 %v385_v26  ;;  %787 = vmatprep.mubr.msk.bf16.mxu1 %vm943_vm0, %v942_v0 }
 0x29c   : > { %797 = vmatprep.subr.bf16.mxu1 %v942_v0 }
 0x2a2   : > { %788 = vmatmul.mubr.msk.bf16.vlgmr.msra.gmra.mxu1 %vm156_vm1, %v378_v28 }
 0x2a3   : > { %798 = vmatpush3.bf16.xpose.msra.mxu1 %v497_v29  ;;  %799 = vmatprep.mubr.msk.bf16.mxu1 %vm943_vm0, %v942_v0 }
 0x2aa   : > { %800 = vmatmul.mubr.msk.bf16.vlgmr.msra.gmra.mxu1 %vm156_vm1, %v490_v30 }
 0x352   : > { %v1077_v31 = vpop.f32.mrf.mxu1 }
 0x354   : > { %v771_v32 = vpop.f32.mrf.mxu1 }
 0x356   : > { %v262_v33 = vpop.f32.mrf.mxu1 }
 0x358   : > { %v772_v34 = vpop.f32.mrf.mxu1 }
 0x35a   : > { %v309_v35 = vpop.f32.mrf.mxu1 }
 0x35b   : > { %v315_v36 = vmul.f32 0.35355338, %v309_v35 }
 0x35c   : > { %v777_v37 = vpop.f32.mrf.mxu1 }
 0x35d   : > { %v316_v38 = vsel %vm156_vm1, %v315_v36, -inf }
 0x35e   : > { %317 = vmax.xlane.f32.xlu1 %v316_v38  ;;  %v312_v39 = vpop.f32.mrf.mxu1 }
 0x360   : > { %v778_v40 = vpop.f32.mrf.mxu1 }
 0x362   : > { %v421_v41 = vpop.f32.mrf.mxu1 }
 0x363   : > { %v427_v42 = vmul.f32 0.35355338, %v421_v41 }
 0x364   : > { %v789_v43 = vpop.f32.mrf.mxu1 }
 0x365   : > { %v428_v44 = vsel %vm156_vm1, %v427_v42, -inf }
 0x366   : > { %429 = vmax.xlane.f32.xlu0 %v428_v44  ;;  %v424_v45 = vpop.f32.mrf.mxu1 }
 0x368   : > { %v790_v46 = vpop.f32.mrf.mxu1 }
 0x36a   : > { %v533_v47 = vpop.f32.mrf.mxu1 }
 0x36b   : > { %v539_v48 = vmul.f32 0.35355338, %v533_v47 }
 0x36c   : > { %v801_v49 = vpop.f32.mrf.mxu1 }
 0x36d   : > { %v540_v50 = vsel %vm156_vm1, %v539_v48, -inf }
 0x36e   : > { %541 = vmax.xlane.f32.xlu1 %v540_v50  ;;  %v536_v51 = vpop.f32.mrf.mxu1 }
 0x370   : > { %v802_v52 = vpop.f32.mrf.mxu1 }
 0x3e7   : > { %v318_v53 = vpop.xlane.xlu1 %317 }
 0x3e8   : > { %v319_v54 = vsub.f32 %v315_v36, %v318_v53 }
 0x3ea   : > { %v320_v55 = vmul.f32 1.442695, %v319_v54 }
 0x3ec   : > { %868 = vpow2.f32 %v320_v55 }
 0x3ef   : > { %v430_v63 = vpop.xlane.xlu0 %429 }
 0x3f0   : > { %v431_v1 = vsub.f32 %v427_v42, %v430_v63 }
 0x3f2   : > { %v432_v3 = vmul.f32 1.442695, %v431_v1 }
 0x3f7   : > { %v542_v56 = vpop.xlane.xlu1 %541 }
 0x3f8   : > { %v543_v57 = vsub.f32 %v539_v48, %v542_v56 }
 0x3f9   : > { %v869_v58 = vpop.eup %868 }
 0x3fa   : > { %v544_v59 = vmul.f32 1.442695, %v543_v57  ;;  %v322_v60 = vsel %vm156_vm1, %v869_v58, 0.0 }
 0x3fb   : > { %323 = vadd.xlane.f32.xlu1 %v322_v60 }
 0x3fc   : > { %870 = vpow2.f32 %v544_v59 }
 0x3fd   : > { %872 = vpow2.f32 %v432_v3 }
 0x409   : > { %v871_v61 = vpop.eup %870 }
 0x40a   : > { %v546_v62 = vsel %vm156_vm1, %v871_v61, 0.0  ;;  %v873_v4 = vpop.eup %872 }
 0x40b   : > { %547 = vadd.xlane.f32.xlu0 %v546_v62  ;;  %v434_v5 = vsel %vm156_vm1, %v873_v4, 0.0 }
 0x40c   : > { %328 = vrot.lane.b32.xlu1 %v1038_v2, %s952_s6 }
 0x421   : > { %440 = vrot.lane.b32.xlu0 %v1038_v2, %s953_s7 }
 0x430   : > { %435 = vadd.xlane.f32.xlu1 %v434_v5 }
 0x441   : > { %552 = vrot.lane.b32.xlu1 %v1038_v2, %s954_s8 }
 0x484   : > { %v324_v6 = vpop.xlane.xlu1 %323 }
 0x485   : > { %874 = vrcp.f32 %v324_v6 }
 0x488   : > { %v329_v7 = vpop.permute.xlu1 %328 }
 0x489   : > { %v334_v8 = vsel %vm221_vm2, %v329_v7, 0 }
 0x48a   : > { %780 = vmatpush3.bf16.msra.mxu0 %v334_v8 }
 0x48b   : > { %791 = vmatprep.subr.bf16.mxu0 %v942_v0 }
 0x492   : > { %v875_v9 = vpop.eup %874 }
 0x493   : > { %v326_v10 = vmul.f32 %v875_v9, %v869_v58 }
 0x494   : > { %v548_v11 = vpop.xlane.xlu0 %547 }
 0x495   : > { %v327_v12 = vpack.c.bf16 %v326_v10, %v326_v10  ;;  %876 = vrcp.f32 %v548_v11  ;;  %v376_v19 = vadd.f32 %v326_v10, %v1058_v21 }
 0x497   : > { %782 = vmatmul.mubr.msk.bf16.vlgmr.msra.gmra.mxu0 %vm156_vm1, %v327_v12 }
 0x498   : > { %v441_v13 = vpop.permute.xlu0 %440  ;;  %793 = vmatprep.mubr.msk.bf16.mxu0 %vm943_vm0, %v942_v0 }
 0x499   : > { %v446_v2 = vsel %vm221_vm2, %v441_v13, 0 }
 0x49a   : > { %792 = vmatpush3.bf16.msra.mxu0 %v446_v2 }
 0x49b   : > { %803 = vmatprep.subr.bf16.mxu0 %v942_v0 }
 0x4a2   : > { %v877_v15 = vpop.eup %876 }
 0x4a3   : > { %v550_v23 = vmul.f32 %v877_v15, %v871_v61 }
 0x4a5   : > { %v551_v21 = vpack.c.bf16 %v550_v23, %v550_v23 }
 0x4b9   : > { %v436_v14 = vpop.xlane.xlu1 %435 }
 0x4ba   : > { %878 = vrcp.f32 %v436_v14 }
 0x4bd   : > { %v553_v17 = vpop.permute.xlu1 %552 }
 0x4be   : > { %v558_v20 = vsel %vm221_vm2, %v553_v17, 0 }
 0x4c7   : > { %v879_v16 = vpop.eup %878 }
 0x4c8   : > { %v438_v18 = vmul.f32 %v879_v16, %v873_v4 }
 0x4ca   : > { %v439_v22 = vpack.c.bf16 %v438_v18, %v438_v18  ;;  %v488_v24 = vadd.f32 %v438_v18, %v376_v19 }
 0x4cc   : > { %794 = vmatmul.mubr.msk.bf16.vlgmr.msra.gmra.mxu0 %vm156_vm1, %v439_v22  ;;  %v600_v25 = vadd.f32 %v550_v23, %v488_v24 }
 0x4cd   : > { %804 = vmatpush3.bf16.msra.mxu0 %v558_v20  ;;  %805 = vmatprep.mubr.msk.bf16.mxu0 %vm943_vm0, %v942_v0 }
 0x4ce   : > { %v620_v26 = vmul.f32 0.25, %v600_v25 }
 0x4d0   : > { %621 = vst.msk [vmem:[%s141_s17] sm:$0xff] %vm156_vm1, %v620_v26 }
 0x4d4   : > { %806 = vmatmul.mubr.msk.bf16.vlgmr.msra.gmra.mxu0 %vm156_vm1, %v551_v21 }
 0x557   : > { %v370_v27 = vpop.f32.mrf.mxu0 }
 0x558   : > { %602 = vrot.lane.b32.xlu1 %v370_v27, %s955_s23 }
 0x559   : > { %v783_v28 = vpop.f32.mrf.mxu0 }
 0x55b   : > { %v373_v29 = vpop.f32.mrf.mxu0 }
 0x55d   : > { %v784_v30 = vpop.f32.mrf.mxu0 }
 0x55e   : > { %893 = shalt.err (!%p890_p3)
}
 0x55f   : > { %s894_s13 = scalar_lea.hbm %s641_s28, 128  ;;  %s898_s8 = scalar_lea.hbm %s1145_s2, 256 }
 0x560   : > { %p895_p4 = scmp.ne.s32.totalorder %s641_s28, %s894_s13  ;;  %p899_p9 = scmp.lt.s32.totalorder %s641_s28, %s1145_s2 }
 0x561   : > { %p900_p10 = scmp.lt.s32.totalorder %s898_s8, %s894_s13 }
 0x562   : > { %p896_p7 = pnand %p895_p4, %p1012_p5 }
 0x563   : > { %p901_p11 = por %p900_p10, %p899_p9 }
 0x564   : > { %p897_p8 = pneg %p896_p7 }
 0x566   : > { %p902_p12 = pnand %p901_p11, %p897_p8 }
 0x568   : > { %905 = shalt.err (!%p902_p12)
}
 0x569   : > { %809 = dma.vmem_to_hbm [thread:$0]  (%p1012_p5), %s644_s25, 128, %s641_s28, %s627_s29   ;;  %vm614_vm3 = vcmask 130048   ;;  %vm616_vm4 = vcmask 195584   ;;  %vm618_vm5 = vcmask 261120  }
 0x56a   : > { %s957_s17 = smov 16   ;;  %s958_s23 = smov 24  }
 0x56b   : > { %s149_s25 = scalar_lea.vmem %s1144_s1, %s731_s22 }
 0x58c   : > { %v482_v0 = vpop.f32.mrf.mxu0 }
 0x58d   : > { %606 = vrot.lane.b32.xlu0 %v482_v0, %s957_s17 }
 0x58e   : > { %v795_v32 = vpop.f32.mrf.mxu0 }
 0x590   : > { %v485_v33 = vpop.f32.mrf.mxu0 }
 0x592   : > { %v796_v34 = vpop.f32.mrf.mxu0 }
 0x594   : > { %v594_v35 = vpop.f32.mrf.mxu0 }
 0x595   : > { %610 = vrot.lane.b32.xlu1 %v594_v35, %s958_s23 }
 0x596   : > { %v807_v36 = vpop.f32.mrf.mxu0 }
 0x598   : > { %v597_v37 = vpop.f32.mrf.mxu0 }
 0x59a   : > { %v808_v38 = vpop.f32.mrf.mxu0 }
 0x5ca   : > { %v603_v39 = vpop.permute.xlu1 %602 }
 0x5cb   : > { %v613_v41 = vsel %vm156_vm1, %v1077_v31, %v603_v39 }
 0x5ff   : > { %v607_v40 = vpop.permute.xlu0 %606 }
 0x600   : > { %v615_v42 = vsel %vm614_vm3, %v613_v41, %v607_v40 }
 0x607   : > { %v611_v43 = vpop.permute.xlu1 %610 }
 0x608   : > { %v617_v44 = vsel %vm616_vm4, %v615_v42, %v611_v43 }
 0x609   : > { %619 = vst.msk [vmem:[%s149_s25] sm:$0xff] %vm618_vm5, %v617_v44 }
 0x60a PF: > { %p815_p5 = scmp.ge.s32.totalorder %s940_s12, 2  ;;  %s662_s26 = sand.u32 1, %s928_s9  }
 0x60b   : > { %s663_s27 = scalar_lea.sflag [#allocation3], %s662_s26 }
 0x60c   : > { %p812_p13 = pnand %p815_p5, %p1016_p6 }
 0x60e   : > { %p813_p0 = pneg %p812_p13 }
 0x610   : > { %923 = dma.done.wait (%p813_p0), %s663_s27, 128  }
 0x611   : > { %925 = vsyncadd (%p813_p0), %s663_s27, 4294967168  ;;  %p13_p1 = scmp.ge.s32.totalorder %s999_s15, 4   ;;  %s1148_s9 = smov %s932_s10 }
 0x612   : > { %s1149_s10 = smov %s936_s11  ;;  %s1150_s11 = smov %s1010_s18 }
 0x613   : > { %s1151_s12 = smov %s999_s15  ;;  %15 = sbr.rel (!%p13_p1) target bundleno = 3 (0x3), region = 71 }
 0x618   :  { %668 = vsyncpa [#allocation3], 1 }
 0x619   :  { %670 = vsyncpa [#allocation3 + $0x1], 1 }

</bundles_post_ra>
